<compile_context>
chip_gen: v7x
topology: tpu7x:2x2x1
jax: 0.10.0
libtpu: 0.0.40
codegen_flags: <defaults>
</compile_context>

<pallas_src>
import jax
import jax.numpy as jnp
from jax.experimental import pallas as pl
from jax.experimental.pallas import tpu as pltpu

IN_FEATURES = 28 * 28   # 784
OUT_FEATURES = 10

K = IN_FEATURES         # full-extent contraction block (no K tiling needed)
N_PAD = 128             # output features padded to one lane width
MAX_TM = 1024           # max batch-tile rows (see header for VMEM/roofline math)


def linear_kernel(x_ref, w_ref, b_ref, o_ref):
    # x_ref: (TM, K) f32, w_ref: (K, N_PAD) bf16, b_ref: (1, N_PAD) f32
    # o_ref: (TM, N_PAD) f32
    x_bf16 = x_ref[...].astype(jnp.bfloat16)   # in-kernel cast: VPU work under DMA
    acc = jnp.dot(x_bf16, w_ref[...], preferred_element_type=jnp.float32)
    o_ref[...] = acc + b_ref[...]


def init_params(weight, bias):
    """One-time parameter prep (do NOT call per forward).

    weight: (OUT_FEATURES, IN_FEATURES) torch-style; bias: (OUT_FEATURES,).
    Returns (w_pad, b_pad) with w_pad: (784, 128) bf16, b_pad: (1, 128) f32.
    """
    w_pad = jnp.zeros((K, N_PAD), jnp.bfloat16).at[:, :OUT_FEATURES].set(
        weight.T.astype(jnp.bfloat16))
    b_pad = jnp.zeros((1, N_PAD), jnp.float32).at[0, :OUT_FEATURES].set(
        bias.astype(jnp.float32))
    return w_pad, b_pad


def _round_up(n, m):
    return ((n + m - 1) // m) * m


def simple_model_forward(x, w_pad, b_pad):
    """x: any shape whose trailing dims flatten to 784 (e.g. (B,1,28,28)), f32.
    w_pad/b_pad: outputs of init_params. Returns (B, OUT_FEATURES) f32."""
    x2d = x.reshape(-1, IN_FEATURES)          # stays f32; cast happens in-kernel
    batch = x2d.shape[0]

    # Tile selection:
    #  * batch <= 1024: one block covering the whole (8-padded) batch -> a
    #    single grid step, which is the only lever for the latency-bound
    #    tiny-batch case.
    #  * batch  > 1024: 1024-row tiles -> few, big steps (per-step overhead
    #    amortized) and >=2 blocks so the "parallel" axis shards across both
    #    TensorCores on v7x. Worst-case double-buffered VMEM ~8.3 MB, under
    #    the default scoped limit on all of v5e/v6e/v7x.
    m_pad = _round_up(batch, 8)
    tm = m_pad if m_pad <= MAX_TM else MAX_TM
    num_blocks = pl.cdiv(m_pad, tm)
    m_total = num_blocks * tm                 # padded output rows; sliced below

    cost = pl.CostEstimate(
        flops=2 * m_total * K * N_PAD,        # real MXU work on padded tiles
        transcendentals=0,
        bytes_accessed=(x2d.size * 4          # f32 activations (cast in-kernel)
                        + w_pad.size * 2      # bf16 weight (resident)
                        + b_pad.size * 4      # f32 bias (resident)
                        + m_total * N_PAD * 4))  # f32 lane-dense output

    out_pad = pl.pallas_call(
        linear_kernel,
        out_shape=jax.ShapeDtypeStruct((m_total, N_PAD), jnp.float32),
        grid=(num_blocks,),
        in_specs=[
            pl.BlockSpec((tm, K), lambda i: (i, 0)),       # x tile per step
            pl.BlockSpec((K, N_PAD), lambda i: (0, 0)),    # weight resident
            pl.BlockSpec((1, N_PAD), lambda i: (0, 0)),    # bias resident
        ],
        out_specs=pl.BlockSpec((tm, N_PAD), lambda i: (i, 0)),
        compiler_params=pltpu.CompilerParams(
            dimension_semantics=("parallel",)),
        cost_estimate=cost,
    )(x2d, w_pad, b_pad)

    # Rows beyond `batch` in the tail block are undefined bits; never reduce
    # over them. A fused consumer should take out_pad directly and defer this
    # slice; we do it here to honor the module's (B, 10) return contract.
    return out_pad[:batch, :OUT_FEATURES]


if __name__ == "__main__":
    key = jax.random.PRNGKey(0)
    kx, kw, kb, kx2 = jax.random.split(key, 4)

    # Deterministic parameters mirroring nn.Linear shapes: (out=10, in=784), (10,)
    bound = 1.0 / (IN_FEATURES ** 0.5)
    weight = jax.random.uniform(kw, (OUT_FEATURES, IN_FEATURES),
                                minval=-bound, maxval=bound, dtype=jnp.float32)
    bias = jax.random.uniform(kb, (OUT_FEATURES,),
                              minval=-bound, maxval=bound, dtype=jnp.float32)

    # One-time param prep (hoisted out of the forward path).
    w_pad, b_pad = init_params(weight, bias)

    # Small MNIST-like batch, NCHW (2, 1, 28, 28); forward flattens it.
    x = jax.random.normal(kx, (2, 1, 28, 28), dtype=jnp.float32)
    out = simple_model_forward(x, w_pad, b_pad)
    jax.block_until_ready(out)

    ref = x.reshape(-1, IN_FEATURES) @ weight.T + bias
    assert out.shape == (2, OUT_FEATURES)
    # bf16 MXU inputs with f32 accumulation -> modest tolerance vs f32 ref.
    assert jnp.allclose(out, ref, atol=5e-2, rtol=5e-2)

    # Second check: batch not a multiple of 8 (exercises 8-row padding + slice).
    x_big = jax.random.normal(kx2, (20, 1, 28, 28), dtype=jnp.float32)
    out_big = simple_model_forward(x_big, w_pad, b_pad)
    jax.block_until_ready(out_big)
    ref_big = x_big.reshape(-1, IN_FEATURES) @ weight.T + bias
    assert out_big.shape == (20, OUT_FEATURES)
    assert jnp.allclose(out_big, ref_big, atol=5e-2, rtol=5e-2)

    print("KERNEL_OK")
</pallas_src>

<mosaic_0001>
module attributes {stable_mosaic.version = 11 : i64} {
  func.func @linear_kernel(%arg0: i32, %arg1: memref<8x784xf32, #tpu.memory_space<vmem>>, %arg2: memref<784x128xbf16, #tpu.memory_space<vmem>>, %arg3: memref<1x128xf32, #tpu.memory_space<vmem>>, %arg4: memref<8x128xf32, #tpu.memory_space<vmem>>) attributes {dimension_semantics = [#tpu.dimension_semantics<parallel>], iteration_bounds = array<i64: 1>, scalar_prefetch = 0 : i64, scratch_operands = 0 : i64, tpu.core_type = #tpu.core_type<tc>, window_params = [{transform_indices = @transform_0, window_bounds = array<i64: 8, 784>}, {pipeline_mode = #tpu.pipeline_mode<synchronous>, transform_indices = @transform_1, window_bounds = array<i64: 784, 128>}, {pipeline_mode = #tpu.pipeline_mode<synchronous>, transform_indices = @transform_2, window_bounds = array<i64: 1, 128>}, {transform_indices = @transform_3, window_bounds = array<i64: 8, 128>}]} {
    %c0 = arith.constant 0 : index
    %c0_0 = arith.constant 0 : index
    %0 = vector.load %arg1[%c0, %c0_0] : memref<8x784xf32, #tpu.memory_space<vmem>>, vector<8x784xf32>
    %1 = arith.truncf %0 : vector<8x784xf32> to vector<8x784xbf16>
    %c0_1 = arith.constant 0 : index
    %c0_2 = arith.constant 0 : index
    %2 = vector.load %arg2[%c0_1, %c0_2] : memref<784x128xbf16, #tpu.memory_space<vmem>>, vector<784x128xbf16>
    %cst = arith.constant dense<0.000000e+00> : vector<8x128xf32>
    %3 = tpu.matmul %1, %2, %cst {dimension_numbers = #tpu.dot_dimension_numbers<[1], [0], [0], [1], [0, 0, 1, 1], [], []>} : vector<8x784xbf16>, vector<784x128xbf16>, vector<8x128xf32> -> vector<8x128xf32>
    %c0_3 = arith.constant 0 : index
    %c0_4 = arith.constant 0 : index
    %4 = vector.load %arg3[%c0_3, %c0_4] : memref<1x128xf32, #tpu.memory_space<vmem>>, vector<1x128xf32>
    %5 = vector.broadcast %4 : vector<1x128xf32> to vector<8x128xf32>
    %6 = arith.addf %3, %5 : vector<8x128xf32>
    %c0_5 = arith.constant 0 : index
    %c0_6 = arith.constant 0 : index
    %7 = vector.load %arg4[%c0_5, %c0_6] : memref<8x128xf32, #tpu.memory_space<vmem>>, vector<8x128xf32>
    tpu.vector_store %arg4[%c0_5, %c0_6], %6 {strides = array<i32>} : memref<8x128xf32, #tpu.memory_space<vmem>>, vector<8x128xf32>,
    return
  }
  func.func @transform_0(%arg0: i32) -> (i32, i32) {
    %c0_i32 = arith.constant 0 : i32
    %c0_i32_0 = arith.constant 0 : i32
    return %arg0, %c0_i32 : i32, i32
  }
  func.func @transform_1(%arg0: i32) -> (i32, i32) {
    %c0_i32 = arith.constant 0 : i32
    %c0_i32_0 = arith.constant 0 : i32
    %c0_i32_1 = arith.constant 0 : i32
    return %c0_i32, %c0_i32_0 : i32, i32
  }
  func.func @transform_2(%arg0: i32) -> (i32, i32) {
    %c0_i32 = arith.constant 0 : i32
    %c0_i32_0 = arith.constant 0 : i32
    %c0_i32_1 = arith.constant 0 : i32
    return %c0_i32, %c0_i32_0 : i32, i32
  }
  func.func @transform_3(%arg0: i32) -> (i32, i32) {
    %c0_i32 = arith.constant 0 : i32
    %c0_i32_0 = arith.constant 0 : i32
    return %arg0, %c0_i32 : i32, i32
  }
}

</mosaic_0001>

<bundles_post_ra>
// kernel: tpu_custom_call.1
= control target key start
LH: loop header
LB: loop body
LE: loop exit
PB: predicated region body
PF: predicated region fallthrough
CT: control target
= control target key end

     0   :  { %8 = vsyncpa [#allocation3], 0  ;;  %s1072_s0 = inlined_call_operand.hbm [shape: f32[2,784], index: 0, kind: input, shape index: {}]   ;;  %s1073_s1 = inlined_call_operand.hbm [shape: bf16[784,128], index: 1, kind: input, shape index: {}]   ;;  %s1074_s2 = inlined_call_operand.vmem [shape: f32[1,128], index: 2, kind: input, shape index: {}]   ;;  %s1075_s3 = inlined_call_operand.hbm [shape: f32[8,128], index: 3, kind: output, shape index: {}]  }
   0x1   :  { %9 = vsyncpa [#allocation6], 0 }
   0x2   :  { %10 = vsyncpa [#allocation4], 0 }
   0x3   :  { %15 = vsyncadd [#allocation3], 672  ;;  %s993_s12 = smov [#allocation2]   ;;  %s921_s16 = scalar_lea.hbm %s1072_s0, 224 }
   0x4   :  { %s16_s13 = sshll.u32 %s993_s12, 4  ;;  %p922_p0 = scmp.ne.s32.totalorder %s1072_s0, %s921_s16  ;;  %s17_s13 = int_to_ptr.vmem [resolvable:$true] %s16_s13 }
   0x5   :  { %p925_p1 = scmp.lt.u32.totalorder %s921_s16, %s1072_s0 }
   0x7   :  { %p927_p2 = pnand %p925_p1, %p922_p0 }
   0x9   :  { %930 = shalt.err (!%p927_p2)
}
   0xa   :  { %s931_s21 = scalar_lea.vmem %s17_s13, 224  ;;  %s935_s22 = scalar_lea.vmem %s17_s13, 896 }
   0xb   :  { %p932_p3 = scmp.ne.s32.totalorder %s17_s13, %s931_s21  ;;  %p936_p4 = scmp.lt.s32.totalorder %s17_s13, %s17_s13 }
   0xc   :  { %p937_p5 = scmp.lt.s32.totalorder %s935_s22, %s931_s21 }
   0xe   :  { %p938_p6 = por %p937_p5, %p936_p4 }
  0x10   :  { %p939_p7 = pnand %p938_p6, %p932_p3 }
  0x12   :  { %942 = shalt.err (!%p939_p7)
}
  0x13   :  { %s994_s23 = smov 224   ;;  %s995_s24 = smov 14  }
  0x14   :  { %22 = dma.hbm_to_vmem [thread:$0]  %s1072_s0, 224, %s17_s13, [#allocation3], %s994_s23, %s994_s23, %s995_s24  }
  0x15   :  { %s996_s27 = smov [#allocation5]   ;;  %s943_s4 = scalar_lea.hbm %s1073_s1, 6272 }
  0x16   :  { %s28_s28 = sshll.u32 %s996_s27, 4  ;;  %p944_p8 = scmp.ne.s32.totalorder %s1073_s1, %s943_s4  ;;  %s29_s28 = int_to_ptr.vmem [resolvable:$true] %s28_s28 }
  0x17   :  { %p947_p9 = scmp.lt.u32.totalorder %s943_s4, %s1073_s1 }
  0x19   :  { %p949_p10 = pnand %p947_p9, %p944_p8 }
  0x1b   :  { %952 = shalt.err (!%p949_p10)
}
  0x1c   :  { %s953_s9 = scalar_lea.vmem %s29_s28, 6272  ;;  %p958_p12 = scmp.lt.s32.totalorder %s29_s28, %s29_s28 }
  0x1d   :  { %p954_p11 = scmp.ne.s32.totalorder %s29_s28, %s953_s9  ;;  %p959_p13 = scmp.lt.s32.totalorder %s953_s9, %s953_s9 }
  0x1f   :  { %p960_p0 = por %p959_p13, %p958_p12 }
  0x21   :  { %p961_p1 = pnand %p960_p0, %p954_p11 }
  0x23   :  { %964 = shalt.err (!%p961_p1)
}
  0x24   :  { %s997_s0 = smov 64   ;;  %s998_s10 = smov 4  }
  0x25   :  { %34 = dma.hbm_to_vmem [thread:$0]  %s1073_s1, 6272, %s29_s28, [#allocation6], %s997_s0, %s997_s0, %s998_s10  }
  0x26   :  { %987 = dma.done.wait [#allocation3], 896  }
  0x27   :  { %988 = vsyncadd [#allocation3], 4294966400 }
  0x28   :  { %989 = dma.done.wait [#allocation6], 6272  }
  0x29   :  { %990 = vsyncadd [#allocation6], 4294961024  ;;  %v860_v0 = vld [vmem:[#allocation5 + $0x40] sm:$0xff]   ;;  %v864_v4 = vld [vmem:[#allocation5 + $0x48] sm:$0xff]   ;;  %v999_v23 = vmov 1983009808   ;;  %v67_v25 = vlaneseq }
  0x2a   :  { %v861_v1 = vld [vmem:[#allocation5] sm:$0xff]   ;;  %776 = vmatprep.subr.bf16.mxu0 %v860_v0  ;;  %v865_v5 = vld [vmem:[#allocation5 + $0x8] sm:$0xff]   ;;  %v868_v8 = vld [vmem:[#allocation5 + $0x50] sm:$0xff]   ;;  %v65_v24 = vunpack.c.l.s4 %v999_v23  ;;  %v1000_v47 = vmov 0.0   ;;  %vm1001_vm0 = vmmov 0   ;;  %vm544_vm1 = vcmask 130048  }
  0x2b   :  { %v862_v2 = vld [vmem:[#allocation5 + $0xc0] sm:$0xff]   ;;  %777 = vmatpush3.bf16.msra.mxu0 %v861_v1  ;;  %v866_v6 = vld [vmem:[#allocation5 + $0xc8] sm:$0xff]   ;;  %v869_v9 = vld [vmem:[#allocation5 + $0x10] sm:$0xff]   ;;  %v68_v31 = vshrl.u32 %v67_v25, 7 }
  0x2c   :  { %v863_v3 = vld [vmem:[#allocation5 + $0x80] sm:$0xff]   ;;  %798 = vmatprep.subr.bf16.mxu1 %v862_v2  ;;  %778 = vmatprep.subr.bf16.mxu0 %v864_v4  ;;  %v867_v7 = vld [vmem:[#allocation5 + $0x88] sm:$0xff]   ;;  %v870_v10 = vld [vmem:[#allocation5 + $0xd0] sm:$0xff]   ;;  %v66_v30 = vunpack.c.0.s8 %v65_v24 }
  0x2d   :  { %799 = vmatpush3.bf16.msra.mxu1 %v863_v3  ;;  %v871_v11 = vld [vmem:[#allocation5 + $0x90] sm:$0xff]   ;;  %v872_v12 = vld [vmem:[#allocation5 + $0x58] sm:$0xff]   ;;  %v876_v16 = vld [vmem:[#allocation5 + $0x60] sm:$0xff]  }
  0x2e   :  { %800 = vmatprep.subr.bf16.mxu1 %v866_v6  ;;  %v873_v13 = vld [vmem:[#allocation5 + $0x18] sm:$0xff]   ;;  %v877_v17 = vld [vmem:[#allocation5 + $0x20] sm:$0xff]   ;;  %v880_v20 = vld [vmem:[#allocation5 + $0x68] sm:$0xff]   ;;  %v1047_v36 = vsub.s32 %v66_v30, %v68_v31 }
  0x2f   :  { %779 = vmatpush3.bf16.msra.mxu0 %v865_v5  ;;  %v874_v14 = vld [vmem:[#allocation5 + $0xd8] sm:$0xff]   ;;  %v878_v18 = vld [vmem:[#allocation5 + $0xe0] sm:$0xff]   ;;  %v881_v21 = vld [vmem:[#allocation5 + $0x28] sm:$0xff]  }
  0x30   :  { %780 = vmatprep.subr.bf16.mxu0 %v868_v8  ;;  %v875_v15 = vld [vmem:[#allocation5 + $0x98] sm:$0xff]   ;;  %v879_v19 = vld [vmem:[#allocation5 + $0xa0] sm:$0xff]   ;;  %v882_v22 = vld [vmem:[#allocation5 + $0xe8] sm:$0xff]  }
  0x31   :  { %801 = vmatpush3.bf16.msra.mxu1 %v867_v7  ;;  %v883_v26 = vld [vmem:[#allocation5 + $0xa8] sm:$0xff]   ;;  %v884_v27 = vld [vmem:[#allocation5 + $0x70] sm:$0xff]   ;;  %v888_v33 = vld [vmem:[#allocation5 + $0x78] sm:$0xff]  }
  0x32   :  { %802 = vmatprep.subr.bf16.mxu1 %v870_v10  ;;  %v885_v28 = vld [vmem:[#allocation5 + $0x30] sm:$0xff]   ;;  %v889_v34 = vld [vmem:[#allocation5 + $0x38] sm:$0xff]   ;;  %v896_v42 = vld [vmem:[#allocation5 + $0x140] sm:$0xff]  }
  0x33   :  { %781 = vmatpush3.bf16.msra.mxu0 %v869_v9  ;;  %v886_v29 = vld [vmem:[#allocation5 + $0xf0] sm:$0xff]   ;;  %v890_v35 = vld [vmem:[#allocation5 + $0xf8] sm:$0xff]   ;;  %v899_v52 = vld [vmem:[#allocation5 + $0x100] sm:$0xff]  }
  0x34   :  { %782 = vmatprep.subr.bf16.mxu0 %v872_v12  ;;  %v887_v32 = vld [vmem:[#allocation5 + $0xb0] sm:$0xff]   ;;  %v895_v39 = vld [vmem:[#allocation5 + $0xb8] sm:$0xff]   ;;  %v900_v55 = vld [vmem:[#allocation5 + $0x148] sm:$0xff]  }
  0x35   :  { %803 = vmatpush3.bf16.msra.mxu1 %v871_v11  ;;  %v891_v37 = vld [vmem:[#allocation2] ss:$14 sps:$4 sm:$0xff]   ;;  %v893_v38 = vld [vmem:[#allocation2 + $0x1c] ss:$14 sps:$4 sm:$0xff]   ;;  %v897_v43 = vld [vmem:[#allocation2 + $0x4] ss:$14 sps:$4 sm:$0xff]  }
  0x36   :  { %804 = vmatprep.subr.bf16.mxu1 %v874_v14  ;;  %v70_v40 = vrot.slane %v891_v37, %v1047_v36  ;;  %v84_v41 = vrot.slane %v893_v38, %v1047_v36  ;;  %v898_v44 = vld [vmem:[#allocation2 + $0x20] ss:$14 sps:$4 sm:$0xff]   ;;  %v77_v48 = vrot.slane %v897_v43, %v1047_v36  ;;  %v906_v63 = vld [vmem:[#allocation5 + $0x160] sm:$0xff]   ;;  %v918_v4 = vld [vmem:[#allocation2 + $0x24] ss:$14 sps:$4 sm:$0xff]  }
  0x37   :  { %783 = vmatpush3.bf16.msra.mxu0 %v873_v13  ;;  %v91_v49 = vrot.slane %v898_v44, %v1047_v36  ;;  %v901_v58 = vld [vmem:[#allocation5 + $0x108] sm:$0xff]   ;;  %v902_v59 = vld [vmem:[#allocation5 + $0x150] sm:$0xff]   ;;  %v904_v61 = vld [vmem:[#allocation5 + $0x158] sm:$0xff]   ;;  %v120_v9 = vrot.slane %v918_v4, %v1047_v36 }
  0x38   :  { %784 = vmatprep.subr.bf16.mxu0 %v876_v16  ;;  %v93_v45 = vcombine.high %v70_v40, %v84_v41  ;;  %v92_v46 = vcombine.low %v70_v40, %v84_v41  ;;  %v903_v60 = vld [vmem:[#allocation5 + $0x110] sm:$0xff]   ;;  %v905_v62 = vld [vmem:[#allocation5 + $0x118] sm:$0xff]   ;;  %v914_v0 = vld [vmem:[#allocation5 + $0x180] sm:$0xff]  }
  0x39   :  { %805 = vmatpush3.bf16.msra.mxu1 %v875_v15  ;;  %v95_v53 = vcombine.high %v77_v48, %v91_v49  ;;  %v94_v54 = vcombine.low %v77_v48, %v91_v49  ;;  %v915_v1 = vld [vmem:[#allocation2 + $0x8] ss:$14 sps:$4 sm:$0xff]   ;;  %v917_v2 = vld [vmem:[#allocation2 + $0xc] ss:$14 sps:$4 sm:$0x33]   ;;  %v908_v6 = vld [vmem:[#allocation5 + $0x168] sm:$0xff]  }
  0x3a   :  { %806 = vmatprep.subr.bf16.mxu1 %v878_v18  ;;  %v139_v50 = vpack.c.bf16 %v93_v45, %v93_v45  ;;  %v138_v51 = vpack.c.bf16 %v92_v46, %v92_v46  ;;  %v907_v3 = vld [vmem:[#allocation5 + $0x120] sm:$0xff]   ;;  %v920_v5 = vld [vmem:[#allocation2 + $0x28] ss:$14 sps:$4 sm:$0x33]   ;;  %v106_v7 = vrot.slane %v915_v1, %v1047_v36  ;;  %v113_v8 = vrot.slane %v917_v2, %v1047_v36  ;;  %v909_v11 = vld [vmem:[#allocation5 + $0x128] sm:$0xff]  }
  0x3b   :  { %785 = vmatpush3.bf16.msra.mxu0 %v877_v17  ;;  %v141_v56 = vpack.c.bf16 %v95_v53, %v95_v53  ;;  %v140_v57 = vpack.c.bf16 %v94_v54, %v94_v54  ;;  %v127_v10 = vrot.slane %v920_v5, %v1047_v36  ;;  %v910_v14 = vld [vmem:[#allocation5 + $0x170] sm:$0xff]   ;;  %v912_v18 = vld [vmem:[#allocation5 + $0x178] sm:$0xff]   ;;  %v725_v23 = vld [vmem:[%s1074_s2] ss:$0 sm:$0xff]  ;;  %s1002_s2 = smov [#allocation7]  }
  0x3c   :  { %786 = vmatprep.subr.bf16.mxu0 %v880_v20  ;;  %580 = vmatprep.mubr.bf16.mxu0 %v139_v50  ;;  %v129_v12 = vcombine.high %v106_v7, %v120_v9  ;;  %v911_v17 = vld [vmem:[#allocation5 + $0x130] sm:$0xff]   ;;  %v913_v20 = vld [vmem:[#allocation5 + $0x138] sm:$0xff]   ;;  %s715_s14 = sshll.u32 %s1002_s2, 4  ;;  %s716_s14 = int_to_ptr.vmem [resolvable:$true] %s715_s14 }
  0x3d   :  { %807 = vmatpush3.bf16.msra.mxu1 %v879_v19  ;;  %620 = vmatprep.mubr.bf16.mxu1 %v141_v56  ;;  %v130_v13 = vcombine.low %v113_v8, %v127_v10  ;;  %v128_v19 = vcombine.low %v106_v7, %v120_v9  ;;  %s965_s15 = scalar_lea.vmem %s716_s14, 128  ;;  %p970_p3 = scmp.lt.s32.totalorder %s716_s14, %s716_s14 }
  0x3e   :  { %808 = vmatprep.subr.bf16.mxu1 %v882_v22  ;;  %v143_v15 = vpack.c.bf16 %v129_v12, %v129_v12  ;;  %p966_p2 = scmp.ne.s32.totalorder %s716_s14, %s965_s15  ;;  %p971_p4 = scmp.lt.s32.totalorder %s965_s15, %s965_s15 }
  0x3f   :  { %787 = vmatpush3.bf16.msra.mxu0 %v881_v21  ;;  %v144_v16 = vpack.c.bf16 %v130_v13, %v130_v13  ;;  %v142_v21 = vpack.c.bf16 %v128_v19, %v128_v19 }
  0x40   :  { %788 = vmatprep.subr.bf16.mxu0 %v884_v27  ;;  %p972_p5 = por %p971_p4, %p970_p3 }
  0x41   :  { %809 = vmatpush3.bf16.msra.mxu1 %v883_v26 }
  0x42   :  { %810 = vmatprep.subr.bf16.mxu1 %v886_v29  ;;  %p973_p6 = pnand %p972_p5, %p966_p2 }
  0x43   :  { %789 = vmatpush3.bf16.msra.mxu0 %v885_v28 }
  0x44   :  { %790 = vmatprep.subr.bf16.mxu0 %v888_v33 }
  0x45   :  { %811 = vmatpush3.bf16.msra.mxu1 %v887_v32 }
  0x46   :  { %812 = vmatprep.subr.bf16.mxu1 %v890_v35 }
  0x47   :  { %791 = vmatpush3.bf16.msra.mxu0 %v889_v34 }
  0x48   :  { %820 = vmatprep.subr.bf16.mxu0 %v896_v42 }
  0x49   :  { %813 = vmatpush3.bf16.msra.mxu1 %v895_v39 }
  0x4a   :  { %844 = vmatprep.subr.bf16.mxu1 %v1000_v47  ;;  %581 = vmatmul.mubr.bf16.vlgmr.msra.gmra.mrb[0].mxu0 %v138_v51 }
  0x4b   :  { %821 = vmatpush3.bf16.msra.mxu0 %v899_v52  ;;  %660 = vmatprep.mubr.bf16.mxu0 %v143_v15 }
  0x4c   :  { %822 = vmatprep.subr.bf16.mxu0 %v900_v55  ;;  %621 = vmatmul.mubr.bf16.vlgmr.msra.gmra.mrb[0].mxu1 %v140_v57 }
  0x4d   :  { %846 = vmatprep.mubr.msk.bf16.mxu1 %vm1001_vm0, %v1000_v47  ;;  %845 = vmatpush3.bf16.msra.mxu1 %v914_v0 }
  0x4f   :  { %823 = vmatpush3.bf16.msra.mxu0 %v901_v58 }
  0x50   :  { %824 = vmatprep.subr.bf16.mxu0 %v902_v59 }
  0x53   :  { %825 = vmatpush3.bf16.msra.mxu0 %v903_v60 }
  0x54   :  { %826 = vmatprep.subr.bf16.mxu0 %v904_v61  ;;  %847 = vmatmul.mubr.msk.bf16.vlgmr.msra.gmra.mrb[4].mxu1 %vm544_vm1, %v144_v16 }
  0x57   :  { %827 = vmatpush3.bf16.msra.mxu0 %v905_v62 }
  0x58   :  { %828 = vmatprep.subr.bf16.mxu0 %v906_v63 }
  0x5b   :  { %829 = vmatpush3.bf16.msra.mxu0 %v907_v3 }
  0x5c   :  { %830 = vmatprep.subr.bf16.mxu0 %v908_v6 }
  0x5f   :  { %831 = vmatpush3.bf16.msra.mxu0 %v909_v11 }
  0x60   :  { %832 = vmatprep.subr.bf16.mxu0 %v910_v14 }
  0x63   :  { %833 = vmatpush3.bf16.msra.mxu0 %v911_v17 }
  0x64   :  { %834 = vmatprep.subr.bf16.mxu0 %v912_v18 }
  0x67   :  { %835 = vmatpush3.bf16.msra.mxu0 %v913_v20 }
  0x6a   :  { %661 = vmatmul.mubr.bf16.vlgmr.msra.gmra.mrb[4].mxu0 %v142_v21 }
 0x11d   :  { %v792_v22 = vpop.f32.mrb[0].mxu0 }
 0x11e   :  { %v793_v24 = vpop.f32.mrb[1].mxu0 }
 0x11f   :  { %v794_v25 = vadd.f32 %v793_v24, %v792_v22  ;;  %v795_v26 = vpop.f32.mrb[2].mxu0  ;;  %v814_v27 = vpop.f32.mrb[0].mxu1 }
 0x120   :  { %v796_v28 = vpop.f32.mrb[3].mxu0  ;;  %v815_v30 = vpop.f32.mrb[1].mxu1 }
 0x121   :  { %v583_v29 = vadd.f32 %v794_v25, %v725_v23  ;;  %v816_v31 = vadd.f32 %v815_v30, %v814_v27  ;;  %v817_v32 = vpop.f32.mrb[2].mxu1 }
 0x122   :  { %v818_v33 = vpop.f32.mrb[3].mxu1 }
 0x123   :  { %v623_v34 = vadd.f32 %v816_v31, %v583_v29 }
 0x127   :  { %v702_v35 = vpop.f32.mrb[4].mxu1 }
 0x128   :  { %v848_v36 = vpop.f32.mrb[5].mxu1 }
 0x129   :  { %v705_v37 = vpop.f32.mrb[6].mxu1 }
 0x12a   :  { %v849_v38 = vpop.f32.mrb[7].mxu1 }
 0x13d   :  { %v836_v39 = vpop.f32.mrb[4].mxu0 }
 0x13e   :  { %v837_v40 = vpop.f32.mrb[5].mxu0 }
 0x13f   :  { %v838_v41 = vadd.f32 %v837_v40, %v836_v39  ;;  %v839_v42 = vpop.f32.mrb[6].mxu0 }
 0x140   :  { %v840_v43 = vpop.f32.mrb[7].mxu0 }
 0x141   :  { %v663_v44 = vadd.f32 %v838_v41, %v623_v34 }
 0x143   :  { %v703_v45 = vadd.f32 %v702_v35, %v663_v44 }
 0x145   :  { %708 = vst [vmem:[#allocation7] sm:$0xff] %v703_v45 }
 0x146   :  { %976 = shalt.err (!%p973_p6)
}
 0x147   :  { %s977_s18 = scalar_lea.hbm %s1075_s3, 128 }
 0x148   :  { %p978_p7 = scmp.ne.s32.totalorder %s1075_s3, %s977_s18  ;;  %p981_p8 = scmp.lt.u32.totalorder %s977_s18, %s1075_s3 }
 0x14a   :  { %p983_p9 = pnand %p981_p8, %p978_p7 }
 0x14c   :  { %986 = shalt.err (!%p983_p9)
}
 0x14d   :  { %718 = dma.vmem_to_hbm [thread:$0]  %s716_s14, 128, %s1075_s3, [#allocation4]  }
 0x14e   :  { %991 = dma.done.wait [#allocation4], 128  }
 0x14f   :  { %992 = vsyncadd [#allocation4], 4294967168 }
 0x150   :  { %722 = vsyncpa [#allocation3], 1 }
 0x151   :  { %723 = vsyncpa [#allocation6], 1 }
 0x152   :  { %724 = vsyncpa [#allocation4], 1 }

</bundles_post_ra>
